<compile_context>
chip_gen: v7x
topology: tpu7x:2x2x1
jax: 0.10.0
libtpu: 0.0.40
codegen_flags: <defaults>
</compile_context>

<pallas_src>
import jax
import jax.numpy as jnp
from jax.experimental import pallas as pl
from jax.experimental.pallas import tpu as pltpu

_SUBLANE = 8


def _round_up(n, m):
    return ((n + m - 1) // m) * m


def _vmem_budget_bytes():
    """Conservative scoped-VMEM budget per TPU generation."""
    try:
        kind = jax.devices()[0].device_kind.lower()
    except Exception:
        kind = ""
    if "v5" in kind or "v6" in kind:
        return 96 * 1024 * 1024   # v5e / v6e: 128 MiB physical VMEM
    return 48 * 1024 * 1024       # v7x: only 64 MiB physical per TC -> stay conservative


def _make_kernel(compute_dtype):
    def kernel(x_ref, w_ref, b_ref, o_ref):
        # In-kernel cast: x arrives as f32 (single HBM read), the MXU consumes
        # compute_dtype (bf16 by default), accumulation stays f32.
        x = x_ref[...].astype(compute_dtype)
        logits = jnp.dot(x, w_ref[...], preferred_element_type=jnp.float32)
        logits = logits + b_ref[...]                     # f32 bias
        m = jnp.max(logits, axis=1, keepdims=True)
        e = jnp.exp(logits - m)
        denom = jnp.sum(e, axis=1, keepdims=True)
        o_ref[...] = (e * pl.reciprocal(denom, approx=True)).astype(o_ref.dtype)
    return kernel


def fold_layers(weights):
    """Collapse the activation-free linear chain into one (in, out) matrix + bias."""
    w_eff = weights[0][:-1, :].astype(jnp.float32)
    b_eff = weights[0][-1:, :].astype(jnp.float32)
    for w_full in weights[1:]:
        wm = w_full[:-1, :].astype(jnp.float32)
        bm = w_full[-1:, :].astype(jnp.float32)
        w_eff = w_eff @ wm
        b_eff = b_eff @ wm + bm
    return w_eff, b_eff  # (in, out), (1, out)


def _choose_tb(batch, in_dim, out_dim, w_bytes, budget, block_rows):
    rows = _round_up(batch, _SUBLANE)
    if rows <= 256:
        tb = rows                                            # tiny batch: one grid step
    else:
        # At least 2 row tiles so the "parallel" batch axis engages both v7x cores.
        tb = min(block_rows, _round_up((rows + 1) // 2, _SUBLANE))
    # VMEM cap: resident W + bias + double-buffered f32 x/out tiles (+ headroom).
    avail = int(budget * 0.75) - w_bytes - out_dim * 4
    per_row = 2 * 4 * (in_dim + out_dim)                     # x tile + out tile, 2 buffers
    if avail > 0:
        cap = max(_SUBLANE, (avail // per_row) // _SUBLANE * _SUBLANE)
        tb = min(tb, cap)
    # TODO(synk): if the resident folded weight alone exceeds the VMEM budget
    # (huge in_dim*out_dim on v7x), tile the class/contraction axes with an
    # online softmax instead of keeping W fully resident.
    return max(_SUBLANE, tb)


def predictor_forward(x, weights, *, block_rows=None, use_bf16=True):
    """x: (B, in_size) f32.  weights: list of (prev+1, next) f32 arrays."""
    batch, in_dim = x.shape
    w_eff, b_eff = fold_layers(weights)
    out_dim = w_eff.shape[1]

    compute_dtype = jnp.bfloat16 if use_bf16 else jnp.float32
    w_k = w_eff.astype(compute_dtype)   # one-time tiny cast of the folded weight
    b_k = b_eff                         # bias stays f32 (added after f32 accumulation)

    budget = _vmem_budget_bytes()
    if block_rows is None:
        block_rows = 1024 if budget >= 96 * 1024 * 1024 else 512  # bigger tiles on v5e/v6e
    w_bytes = in_dim * out_dim * jnp.dtype(compute_dtype).itemsize
    tb = _choose_tb(batch, in_dim, out_dim, w_bytes, budget, block_rows)
    grid = (pl.cdiv(batch, tb),)

    def run(single_buffer_resident):
        if single_buffer_resident:
            w_spec = pl.BlockSpec((in_dim, out_dim), lambda i: (0, 0),
                                  pipeline_mode=pl.Buffered(1))
            b_spec = pl.BlockSpec((1, out_dim), lambda i: (0, 0),
                                  pipeline_mode=pl.Buffered(1))
        else:
            w_spec = pl.BlockSpec((in_dim, out_dim), lambda i: (0, 0))
            b_spec = pl.BlockSpec((1, out_dim), lambda i: (0, 0))
        return pl.pallas_call(
            _make_kernel(compute_dtype),
            out_shape=jax.ShapeDtypeStruct((batch, out_dim), x.dtype),
            grid_spec=pltpu.PrefetchScalarGridSpec(
                num_scalar_prefetch=0,
                grid=grid,
                in_specs=[
                    pl.BlockSpec((tb, in_dim), lambda i: (i, 0)),   # pipelined x row tile
                    w_spec,                                          # resident folded weight
                    b_spec,                                          # resident folded bias
                ],
                out_specs=pl.BlockSpec((tb, out_dim), lambda i: (i, 0)),
            ),
            compiler_params=pltpu.CompilerParams(
                dimension_semantics=("parallel",),   # row tiles shard over v7x's 2 TCs
                vmem_limit_bytes=budget,
            ),
        )(x, w_k, b_k)

    try:
        return run(single_buffer_resident=True)
    except Exception:
        # jax versions without BlockSpec.pipeline_mode / Buffered(1): default buffering.
        return run(single_buffer_resident=False)


def init_weights(key, input_size, layers_sizes):
    """Deterministic synthetic init matching torch.randn(...) * 0.1 shapes."""
    weights = []
    prev = input_size
    for sz in layers_sizes:
        key, sub = jax.random.split(key)
        w = jax.random.normal(sub, (prev + 1, sz), dtype=jnp.float32) * 0.1
        weights.append(w)
        prev = sz
    return weights


def reference_forward(x, weights):
    """Pure-JAX reference mirroring the PyTorch forward exactly."""
    ones = jnp.ones((x.shape[0], 1), dtype=x.dtype)
    resp = jnp.concatenate([x, ones], axis=1)
    for w in weights:
        r = resp @ w
        resp = jnp.concatenate([r, jnp.ones((r.shape[0], 1), dtype=r.dtype)], axis=1)
    resp = resp[:, :-1]
    return jax.nn.softmax(resp, axis=1)


if __name__ == "__main__":
    key = jax.random.PRNGKey(0)
    batch = 8
    input_size = 32
    layers_sizes = [16, 8]

    kx, kw = jax.random.split(key)
    x = jax.random.normal(kx, (batch, input_size), dtype=jnp.float32)
    weights = init_weights(kw, input_size, layers_sizes)

    ref = reference_forward(x, weights)

    # f32 path: structurally exact (only layer-folding / approx-reciprocal rounding).
    out_f32 = jax.block_until_ready(predictor_forward(x, weights, use_bf16=False))
    assert out_f32.shape == (batch, layers_sizes[-1])
    assert jnp.allclose(out_f32, ref, atol=3e-3, rtol=3e-3), "f32 mismatch vs reference"

    # bf16 MXU path (default): loosened tolerance vs the pure-f32 reference.
    out = jax.block_until_ready(predictor_forward(x, weights))
    assert out.shape == (batch, layers_sizes[-1])
    assert jnp.allclose(out, ref, atol=2e-2, rtol=2e-2), "bf16 mismatch vs reference"
    assert jnp.allclose(jnp.sum(out, axis=1), 1.0, atol=1e-2), "softmax rows must sum to 1"

    print("KERNEL_OK")
</pallas_src>

<mosaic_0001>
module attributes {stable_mosaic.version = 11 : i64} {
  func.func @kernel(%arg0: i32, %arg1: memref<8x32xf32, #tpu.memory_space<vmem>>, %arg2: memref<32x8xf32, #tpu.memory_space<vmem>>, %arg3: memref<1x8xf32, #tpu.memory_space<vmem>>, %arg4: memref<8x8xf32, #tpu.memory_space<vmem>>) attributes {dimension_semantics = [#tpu.dimension_semantics<parallel>], iteration_bounds = array<i64: 1>, scalar_prefetch = 0 : i64, scratch_operands = 0 : i64, tpu.core_type = #tpu.core_type<tc>, window_params = [{transform_indices = @transform_0, window_bounds = array<i64: 8, 32>}, {pipeline_mode = #tpu.pipeline_mode<synchronous>, transform_indices = @transform_1, window_bounds = array<i64: 32, 8>}, {pipeline_mode = #tpu.pipeline_mode<synchronous>, transform_indices = @transform_2, window_bounds = array<i64: 1, 8>}, {transform_indices = @transform_3, window_bounds = array<i64: 8, 8>}]} {
    %c0 = arith.constant 0 : index
    %c0_0 = arith.constant 0 : index
    %0 = vector.load %arg1[%c0, %c0_0] : memref<8x32xf32, #tpu.memory_space<vmem>>, vector<8x32xf32>
    %c0_1 = arith.constant 0 : index
    %c0_2 = arith.constant 0 : index
    %1 = vector.load %arg2[%c0_1, %c0_2] : memref<32x8xf32, #tpu.memory_space<vmem>>, vector<32x8xf32>
    %cst = arith.constant dense<0.000000e+00> : vector<8x8xf32>
    %2 = tpu.matmul %0, %1, %cst {dimension_numbers = #tpu.dot_dimension_numbers<[1], [0], [0], [1], [0, 0, 1, 1], [], []>} : vector<8x32xf32>, vector<32x8xf32>, vector<8x8xf32> -> vector<8x8xf32>
    %c0_3 = arith.constant 0 : index
    %c0_4 = arith.constant 0 : index
    %3 = vector.load %arg3[%c0_3, %c0_4] : memref<1x8xf32, #tpu.memory_space<vmem>>, vector<1x8xf32>
    %4 = vector.broadcast %3 : vector<1x8xf32> to vector<8x8xf32>
    %5 = arith.addf %2, %4 : vector<8x8xf32>
    %cst_5 = arith.constant dense<0xFF800000> : vector<8xf32>
    %6 = vector.multi_reduction <maximumf>, %5, %cst_5 [1] : vector<8x8xf32> to vector<8xf32>
    %7 = vector.shape_cast %6 : vector<8xf32> to vector<8x1xf32>
    %8 = vector.broadcast %7 : vector<8x1xf32> to vector<8x8xf32>
    %9 = arith.subf %5, %8 : vector<8x8xf32>
    %10 = math.exp %9 : vector<8x8xf32>
    %cst_6 = arith.constant dense<0.000000e+00> : vector<8xf32>
    %11 = vector.multi_reduction <add>, %10, %cst_6 [1] : vector<8x8xf32> to vector<8xf32>
    %12 = vector.shape_cast %11 : vector<8xf32> to vector<8x1xf32>
    %13 = tpu.reciprocal %12 {approx = true} : vector<8x1xf32> -> vector<8x1xf32>
    %14 = vector.broadcast %13 : vector<8x1xf32> to vector<8x8xf32>
    %15 = arith.mulf %10, %14 : vector<8x8xf32>
    %c0_7 = arith.constant 0 : index
    %c0_8 = arith.constant 0 : index
    %16 = vector.load %arg4[%c0_7, %c0_8] : memref<8x8xf32, #tpu.memory_space<vmem>>, vector<8x8xf32>
    tpu.vector_store %arg4[%c0_7, %c0_8], %15 {strides = array<i32>} : memref<8x8xf32, #tpu.memory_space<vmem>>, vector<8x8xf32>,
    return
  }
  func.func @transform_0(%arg0: i32) -> (i32, i32) {
    %c0_i32 = arith.constant 0 : i32
    %c0_i32_0 = arith.constant 0 : i32
    return %arg0, %c0_i32 : i32, i32
  }
  func.func @transform_1(%arg0: i32) -> (i32, i32) {
    %c0_i32 = arith.constant 0 : i32
    %c0_i32_0 = arith.constant 0 : i32
    %c0_i32_1 = arith.constant 0 : i32
    return %c0_i32, %c0_i32_0 : i32, i32
  }
  func.func @transform_2(%arg0: i32) -> (i32, i32) {
    %c0_i32 = arith.constant 0 : i32
    %c0_i32_0 = arith.constant 0 : i32
    %c0_i32_1 = arith.constant 0 : i32
    return %c0_i32, %c0_i32_0 : i32, i32
  }
  func.func @transform_3(%arg0: i32) -> (i32, i32) {
    %c0_i32 = arith.constant 0 : i32
    %c0_i32_0 = arith.constant 0 : i32
    return %arg0, %c0_i32 : i32, i32
  }
}

module attributes {stable_mosaic.version = 11 : i64} {
  func.func @kernel(%arg0: i32, %arg1: memref<8x32xf32, #tpu.memory_space<vmem>>, %arg2: memref<32x8xf32, #tpu.memory_space<vmem>>, %arg3: memref<1x8xf32, #tpu.memory_space<vmem>>, %arg4: memref<8x8xf32, #tpu.memory_space<vmem>>) attributes {dimension_semantics = [#tpu.dimension_semantics<parallel>], iteration_bounds = array<i64: 1>, scalar_prefetch = 0 : i64, scratch_operands = 0 : i64, tpu.core_type = #tpu.core_type<tc>, window_params = [{transform_indices = @transform_0, window_bounds = array<i64: 8, 32>}, {pipeline_mode = #tpu.pipeline_mode<synchronous>, transform_indices = @transform_1, window_bounds = array<i64: 32, 8>}, {pipeline_mode = #tpu.pipeline_mode<synchronous>, transform_indices = @transform_2, window_bounds = array<i64: 1, 8>}, {transform_indices = @transform_3, window_bounds = array<i64: 8, 8>}]} {
    %c0 = arith.constant 0 : index
    %c0_0 = arith.constant 0 : index
    %0 = vector.load %arg1[%c0, %c0_0] : memref<8x32xf32, #tpu.memory_space<vmem>>, vector<8x32xf32>
    %c0_1 = arith.constant 0 : index
    %c0_2 = arith.constant 0 : index
    %1 = vector.load %arg2[%c0_1, %c0_2] : memref<32x8xf32, #tpu.memory_space<vmem>>, vector<32x8xf32>
    %cst = arith.constant dense<0.000000e+00> : vector<8x8xf32>
    %2 = tpu.matmul %0, %1, %cst {dimension_numbers = #tpu.dot_dimension_numbers<[1], [0], [0], [1], [0, 0, 1, 1], [], []>} : vector<8x32xf32>, vector<32x8xf32>, vector<8x8xf32> -> vector<8x8xf32>
    %c0_3 = arith.constant 0 : index
    %c0_4 = arith.constant 0 : index
    %3 = vector.load %arg3[%c0_3, %c0_4] : memref<1x8xf32, #tpu.memory_space<vmem>>, vector<1x8xf32>
    %4 = vector.broadcast %3 : vector<1x8xf32> to vector<8x8xf32>
    %5 = arith.addf %2, %4 : vector<8x8xf32>
    %cst_5 = arith.constant dense<0xFF800000> : vector<8xf32>
    %6 = vector.multi_reduction <maximumf>, %5, %cst_5 [1] : vector<8x8xf32> to vector<8xf32>
    %7 = vector.shape_cast %6 : vector<8xf32> to vector<8x1xf32>
    %8 = vector.broadcast %7 : vector<8x1xf32> to vector<8x8xf32>
    %9 = arith.subf %5, %8 : vector<8x8xf32>
    %10 = math.exp %9 : vector<8x8xf32>
    %cst_6 = arith.constant dense<0.000000e+00> : vector<8xf32>
    %11 = vector.multi_reduction <add>, %10, %cst_6 [1] : vector<8x8xf32> to vector<8xf32>
    %12 = vector.shape_cast %11 : vector<8xf32> to vector<8x1xf32>
    %13 = tpu.reciprocal %12 {approx = true} : vector<8x1xf32> -> vector<8x1xf32>
    %14 = vector.broadcast %13 : vector<8x1xf32> to vector<8x8xf32>
    %15 = arith.mulf %10, %14 : vector<8x8xf32>
    %c0_7 = arith.constant 0 : index
    %c0_8 = arith.constant 0 : index
    %16 = vector.load %arg4[%c0_7, %c0_8] : memref<8x8xf32, #tpu.memory_space<vmem>>, vector<8x8xf32>
    tpu.vector_store %arg4[%c0_7, %c0_8], %15 {strides = array<i32>} : memref<8x8xf32, #tpu.memory_space<vmem>>, vector<8x8xf32>,
    return
  }
  func.func @transform_0(%arg0: i32) -> (i32, i32) {
    %c0_i32 = arith.constant 0 : i32
    %c0_i32_0 = arith.constant 0 : i32
    return %arg0, %c0_i32 : i32, i32
  }
  func.func @transform_1(%arg0: i32) -> (i32, i32) {
    %c0_i32 = arith.constant 0 : i32
    %c0_i32_0 = arith.constant 0 : i32
    %c0_i32_1 = arith.constant 0 : i32
    return %c0_i32, %c0_i32_0 : i32, i32
  }
  func.func @transform_2(%arg0: i32) -> (i32, i32) {
    %c0_i32 = arith.constant 0 : i32
    %c0_i32_0 = arith.constant 0 : i32
    %c0_i32_1 = arith.constant 0 : i32
    return %c0_i32, %c0_i32_0 : i32, i32
  }
  func.func @transform_3(%arg0: i32) -> (i32, i32) {
    %c0_i32 = arith.constant 0 : i32
    %c0_i32_0 = arith.constant 0 : i32
    return %arg0, %c0_i32 : i32, i32
  }
}

</mosaic_0001>

<bundles_post_ra>
// kernel: tpu_custom_call.1
= control target key start
LH: loop header
LB: loop body
LE: loop exit
PB: predicated region body
PF: predicated region fallthrough
CT: control target
= control target key end

     0   :  { %v184_v3 = vmov 0.0|0.0   ;;  %vm185_vm0 = vmmov 0   ;;  %v186_v6 = vmov 0.0   ;;  %s241_s0 = inlined_call_operand.vmem [shape: f32[8,32], index: 0, kind: input, shape index: {}]   ;;  %s242_s1 = inlined_call_operand.vmem [shape: f32[32,8], index: 1, kind: input, shape index: {}]   ;;  %s243_s2 = inlined_call_operand.vmem [shape: f32[1,8], index: 2, kind: input, shape index: {}]   ;;  %s244_s3 = inlined_call_operand.hbm [shape: f32[8,8], index: 3, kind: output, shape index: {}]  }
   0x1   :  { %v16_v0 = vld [vmem:[%s242_s1] sm:$0xff]  ;;  %v17_v1 = vld [vmem:[%s242_s1 + $0x8] sm:$0xff]  ;;  %v18_v2 = vld [vmem:[%s242_s1 + $0x10] sm:$0xff]  ;;  %146 = vmatprep.subr.bf16.mxu0 %v184_v3  ;;  %143 = vmatprep.mubr.msk.f32.mxu0 %vm185_vm0, %v186_v6 }
   0x2   :  { %v147_v4 = vpack.c.bf16 %v17_v1, %v16_v0  ;;  %v19_v5 = vld [vmem:[%s242_s1 + $0x18] sm:$0xff] }
   0x3   :  { %8 = vsyncpa [#allocation3], 0  ;;  %v150_v7 = vpack.c.bf16 %v19_v5, %v18_v2  ;;  %v15_v8 = vld [vmem:[%s241_s0] sm:$0xff]  ;;  %vm27_vm1 = vcmask 261120   ;;  %vm101_vm2 = vcmask 64512   ;;  %s187_s0 = smov [#allocation2]  }
   0x4   :  { %148 = vmatpush3.bf16.msra.mxu0 %v147_v4  ;;  %v128_v9 = vld [vmem:[%s243_s2] ss:$0 sm:$0xff]  ;;  %s120_s1 = sshll.u32 %s187_s0, 4  ;;  %s121_s1 = int_to_ptr.vmem [resolvable:$true] %s120_s1 }
   0x5   :  { %149 = vmatprep.subr.bf16.mxu0 %v184_v3  ;;  %s160_s2 = scalar_lea.vmem %s121_s1, 128  ;;  %p165_p1 = scmp.lt.s32.totalorder %s121_s1, %s121_s1 }
   0x6   :  { %p161_p0 = scmp.ne.s32.totalorder %s121_s1, %s160_s2  ;;  %p166_p2 = scmp.lt.s32.totalorder %s160_s2, %s160_s2 }
   0x8   :  { %151 = vmatpush3.bf16.msra.mxu0 %v150_v7  ;;  %p167_p3 = por %p166_p2, %p165_p1 }
   0xa   :  { %p168_p4 = pnand %p167_p3, %p161_p0 }
   0xb   :  { %144 = vmatmul.mubr.msk.f32.vlgmr.msra.gmra.mrb[0].mxu0 %vm27_vm1, %v15_v8 }
  0xde   :  { %v97_v10 = vpop.f32.mrb[0].mxu0 }
  0xdf   :  { %v98_v11 = vadd.f32 %v128_v9, %v97_v10  ;;  %v145_v12 = vpop.f32.mrb[1].mxu0 }
  0xe1   :  { %v102_v13 = vsel %vm101_vm2, %v98_v11, -inf }
  0xe2   :  { %103 = vmax.xlane.f32.xlu0 %v102_v13 }
 0x16f   :  { %v104_v14 = vpop.xlane.xlu0 %103 }
 0x170   :  { %v105_v15 = vsub.f32 %v98_v11, %v104_v14 }
 0x172   :  { %v106_v16 = vmul.f32 1.442695, %v105_v15 }
 0x174   :  { %156 = vpow2.f32 %v106_v16 }
 0x17e   :  { %v157_v17 = vpop.eup %156 }
 0x17f   :  { %v108_v18 = vsel %vm101_vm2, %v157_v17, 0.0 }
 0x180   :  { %109 = vadd.xlane.f32.xlu0 %v108_v18 }
 0x20d   :  { %v110_v19 = vpop.xlane.xlu0 %109 }
 0x20e   :  { %158 = vrcp.f32 %v110_v19 }
 0x218   :  { %v159_v20 = vpop.eup %158 }
 0x219   :  { %v112_v21 = vmul.f32 %v159_v20, %v157_v17 }
 0x21b   :  { %113 = vst.msk [vmem:[#allocation2] sm:$0xff] %vm101_vm2, %v112_v21 }
 0x21c   :  { %171 = shalt.err (!%p168_p4)
}
 0x21d   :  { %s172_s26 = scalar_lea.hbm %s244_s3, 128 }
 0x21e   :  { %p173_p5 = scmp.ne.s32.totalorder %s244_s3, %s172_s26  ;;  %p176_p6 = scmp.lt.u32.totalorder %s172_s26, %s244_s3 }
 0x220   :  { %p178_p7 = pnand %p176_p6, %p173_p5 }
 0x222   :  { %181 = shalt.err (!%p178_p7)
}
 0x223   :  { %123 = dma.vmem_to_hbm [thread:$0]  %s121_s1, 128, %s244_s3, [#allocation3]  }
 0x224   :  { %182 = dma.done.wait [#allocation3], 128  }
 0x225   :  { %183 = vsyncadd [#allocation3], 4294967168 }
 0x226   :  { %127 = vsyncpa [#allocation3], 1 }

// kernel: tpu_custom_call.1
= control target key start
LH: loop header
LB: loop body
LE: loop exit
PB: predicated region body
PF: predicated region fallthrough
CT: control target
= control target key end

     0   :  { %v184_v3 = vmov 0.0|0.0   ;;  %vm185_vm0 = vmmov 0   ;;  %v186_v6 = vmov 0.0   ;;  %s241_s0 = inlined_call_operand.vmem [shape: f32[8,32], index: 0, kind: input, shape index: {}]   ;;  %s242_s1 = inlined_call_operand.vmem [shape: f32[32,8], index: 1, kind: input, shape index: {}]   ;;  %s243_s2 = inlined_call_operand.vmem [shape: f32[1,8], index: 2, kind: input, shape index: {}]   ;;  %s244_s3 = inlined_call_operand.hbm [shape: f32[8,8], index: 3, kind: output, shape index: {}]  }
   0x1   :  { %v16_v0 = vld [vmem:[%s242_s1] sm:$0xff]  ;;  %v17_v1 = vld [vmem:[%s242_s1 + $0x8] sm:$0xff]  ;;  %v18_v2 = vld [vmem:[%s242_s1 + $0x10] sm:$0xff]  ;;  %146 = vmatprep.subr.bf16.mxu0 %v184_v3  ;;  %143 = vmatprep.mubr.msk.f32.mxu0 %vm185_vm0, %v186_v6 }
   0x2   :  { %v147_v4 = vpack.c.bf16 %v17_v1, %v16_v0  ;;  %v19_v5 = vld [vmem:[%s242_s1 + $0x18] sm:$0xff] }
   0x3   :  { %8 = vsyncpa [#allocation3], 0  ;;  %v150_v7 = vpack.c.bf16 %v19_v5, %v18_v2  ;;  %v15_v8 = vld [vmem:[%s241_s0] sm:$0xff]  ;;  %vm27_vm1 = vcmask 261120   ;;  %vm101_vm2 = vcmask 64512   ;;  %s187_s0 = smov [#allocation2]  }
   0x4   :  { %148 = vmatpush3.bf16.msra.mxu0 %v147_v4  ;;  %v128_v9 = vld [vmem:[%s243_s2] ss:$0 sm:$0xff]  ;;  %s120_s1 = sshll.u32 %s187_s0, 4  ;;  %s121_s1 = int_to_ptr.vmem [resolvable:$true] %s120_s1 }
   0x5   :  { %149 = vmatprep.subr.bf16.mxu0 %v184_v3  ;;  %s160_s2 = scalar_lea.vmem %s121_s1, 128  ;;  %p165_p1 = scmp.lt.s32.totalorder %s121_s1, %s121_s1 }
   0x6   :  { %p161_p0 = scmp.ne.s32.totalorder %s121_s1, %s160_s2  ;;  %p166_p2 = scmp.lt.s32.totalorder %s160_s2, %s160_s2 }
   0x8   :  { %151 = vmatpush3.bf16.msra.mxu0 %v150_v7  ;;  %p167_p3 = por %p166_p2, %p165_p1 }
   0xa   :  { %p168_p4 = pnand %p167_p3, %p161_p0 }
   0xb   :  { %144 = vmatmul.mubr.msk.f32.vlgmr.msra.gmra.mrb[0].mxu0 %vm27_vm1, %v15_v8 }
  0xde   :  { %v97_v10 = vpop.f32.mrb[0].mxu0 }
  0xdf   :  { %v98_v11 = vadd.f32 %v128_v9, %v97_v10  ;;  %v145_v12 = vpop.f32.mrb[1].mxu0 }
  0xe1   :  { %v102_v13 = vsel %vm101_vm2, %v98_v11, -inf }
  0xe2   :  { %103 = vmax.xlane.f32.xlu0 %v102_v13 }
 0x16f   :  { %v104_v14 = vpop.xlane.xlu0 %103 }
 0x170   :  { %v105_v15 = vsub.f32 %v98_v11, %v104_v14 }
 0x172   :  { %v106_v16 = vmul.f32 1.442695, %v105_v15 }
 0x174   :  { %156 = vpow2.f32 %v106_v16 }
 0x17e   :  { %v157_v17 = vpop.eup %156 }
 0x17f   :  { %v108_v18 = vsel %vm101_vm2, %v157_v17, 0.0 }
 0x180   :  { %109 = vadd.xlane.f32.xlu0 %v108_v18 }
 0x20d   :  { %v110_v19 = vpop.xlane.xlu0 %109 }
 0x20e   :  { %158 = vrcp.f32 %v110_v19 }
 0x218   :  { %v159_v20 = vpop.eup %158 }
 0x219   :  { %v112_v21 = vmul.f32 %v159_v20, %v157_v17 }
 0x21b   :  { %113 = vst.msk [vmem:[#allocation2] sm:$0xff] %vm101_vm2, %v112_v21 }
 0x21c   :  { %171 = shalt.err (!%p168_p4)
}
 0x21d   :  { %s172_s26 = scalar_lea.hbm %s244_s3, 128 }
 0x21e   :  { %p173_p5 = scmp.ne.s32.totalorder %s244_s3, %s172_s26  ;;  %p176_p6 = scmp.lt.u32.totalorder %s172_s26, %s244_s3 }
 0x220   :  { %p178_p7 = pnand %p176_p6, %p173_p5 }
 0x222   :  { %181 = shalt.err (!%p178_p7)
}
 0x223   :  { %123 = dma.vmem_to_hbm [thread:$0]  %s121_s1, 128, %s244_s3, [#allocation3]  }
 0x224   :  { %182 = dma.done.wait [#allocation3], 128  }
 0x225   :  { %183 = vsyncadd [#allocation3], 4294967168 }
 0x226   :  { %127 = vsyncpa [#allocation3], 1 }

</bundles_post_ra>
